<compile_context>
chip_gen: v7x
topology: tpu7x:2x2x1
jax: 0.10.0
libtpu: 0.0.40
codegen_flags: <defaults>
</compile_context>

<pallas_src>
import functools

import jax
import jax.numpy as jnp
from jax.experimental import pallas as pl
from jax.experimental.pallas import tpu as pltpu


def _gin_kernel(a_ref, xk_ref, xd_ref, b1_ref, w2_ref, b2_ref, o_ref, acc_ref,
                *, eps):
    """Grid = (batch, node-row tile, neighbor-column tile).

    a_ref  : (tn, tk)       A tile (block (i, k))
    xk_ref : (1, tk, h_pad) XW1 K-tile (block (b, k, 0))
    xd_ref : (1, tn, h_pad) XW1 row-tile (block (b, i, 0)) -- self-loop term
    acc_ref: (tn, h_pad)    f32 accumulator, persists across the k axis
    """
    k = pl.program_id(2)

    @pl.when(k == 0)
    def _init():
        # Self-loop folded in: A_hat @ XW1 == A @ XW1 + (1 + eps) * XW1[rows]
        acc_ref[...] = (1.0 + eps) * xd_ref[0].astype(jnp.float32)

    # Lane-dense N^2 matmul: (tn, tk) @ (tk, h_pad) -> (tn, h_pad), f32 acc.
    acc_ref[...] += jnp.dot(a_ref[...], xk_ref[0],
                            preferred_element_type=jnp.float32)

    @pl.when(k == pl.num_programs(2) - 1)
    def _finalize():
        # MLP layer 1 epilogue: bias (BN folded) + ReLU, all f32 on the VPU.
        h1 = jnp.maximum(acc_ref[...] + b1_ref[...], 0.0)
        # MLP layer 2: Linear.
        y = jnp.dot(h1.astype(w2_ref.dtype), w2_ref[...],
                    preferred_element_type=jnp.float32) + b2_ref[...]
        o_ref[0] = y.astype(o_ref.dtype)


def _round_up(x, m):
    return ((x + m - 1) // m) * m


def _choose_tiling(n, batch):
    """Returns (n_pad, tn, tk) with tn % 8 == 0, tn | n_pad, tk | n_pad and
    (tk % 128 == 0 or tk == n_pad)."""
    if n <= 256:
        n_pad = _round_up(n, 16)
        tk = n_pad                    # single K step; tk == full dim
        if batch >= 2:
            tn = n_pad                # megacore already fed by the batch axis
        else:
            tn = n_pad // 2           # >= 2 parallel row tiles (v7x 2 TCs)
        return n_pad, tn, tk
    n_pad = _round_up(n, 256)
    tn = 256
    tk = 512 if n_pad % 512 == 0 else 256
    return n_pad, tn, tk


def gin_forward(features, A, params, eps=0.01, matmul_dtype=jnp.bfloat16):
    """features: (B, N, C_in) f32, A: (N, N) f32 (binary adjacency).

    matmul_dtype=bfloat16 (default) feeds the MXU with bf16 operands; A is
    0/1 so it is exact, accumulation is f32.  Pass jnp.float32 for exact math.
    """
    B, N, C_in = features.shape
    H = params["w1"].shape[1]
    out_dim = params["w2"].shape[1]

    # ---- Fold eval-mode BatchNorm + bias into the first Linear.
    bn_scale = params["bn_gamma"] / jnp.sqrt(params["bn_var"] + 1e-5)
    bn_shift = params["bn_beta"] - params["bn_mean"] * bn_scale
    w1 = params["w1"] * bn_scale[None, :]
    b1 = params["b1"] * bn_scale + bn_shift

    # ---- Pad hidden / output lane dims to 128 (lane-dense MXU output,
    #      unmasked vst).  Extra columns are exactly zero.
    h_pad = _round_up(H, 128)
    o_pad = _round_up(out_dim, 128)
    w1p = jnp.zeros((C_in, h_pad), jnp.float32).at[:, :H].set(w1)
    b1p = jnp.zeros((1, h_pad), jnp.float32).at[:, :H].set(b1)
    w2p = jnp.zeros((h_pad, o_pad), jnp.float32).at[:H, :out_dim].set(params["w2"])
    b2p = jnp.zeros((1, o_pad), jnp.float32).at[:, :out_dim].set(params["b2"])

    # ---- Algebraic reorder (wrapper-side): XW1 = X @ W1_folded, computed in
    #      f32, so the kernel's N^2 matmul is lane-dense.
    xw1 = jnp.einsum("bnc,ch->bnh", features, w1p)                # (B, N, h_pad)

    # ---- Zero-pad the node dimension and pick tiles.
    n_pad, tn, tk = _choose_tiling(N, B)
    a_p = jnp.zeros((n_pad, n_pad), jnp.float32).at[:N, :N].set(A)
    xw1_p = jnp.zeros((B, n_pad, h_pad), jnp.float32).at[:, :N, :].set(xw1)

    a_in = a_p.astype(matmul_dtype)          # 0/1 -> exact in bf16
    xw1_in = xw1_p.astype(matmul_dtype)
    w2_in = w2p.astype(matmul_dtype)

    grid = (B, n_pad // tn, n_pad // tk)

    # ---- Explicit VMEM budget from the block sizes (headroom under v7x 64 MiB).
    msize = jnp.dtype(matmul_dtype).itemsize
    vmem_needed = (
        2 * tn * tk * msize                 # A tile, double-buffered
        + 2 * tk * h_pad * msize            # XW1 K-tile
        + 2 * tn * h_pad * msize            # XW1 row-tile (self-loop)
        + 2 * tn * o_pad * 4                # output tile (f32)
        + tn * h_pad * 4                    # f32 accumulator scratch
        + 2 * (h_pad * o_pad * msize + (h_pad + o_pad) * 4)  # weights / biases
    )
    vmem_limit = int(min(64 << 20, max(2 * vmem_needed, 16 << 20)))

    out_padded = pl.pallas_call(
        functools.partial(_gin_kernel, eps=float(eps)),
        out_shape=jax.ShapeDtypeStruct((B, n_pad, o_pad), jnp.float32),
        grid_spec=pltpu.PrefetchScalarGridSpec(
            num_scalar_prefetch=0,
            grid=grid,
            in_specs=[
                pl.BlockSpec((tn, tk), lambda b, i, k: (i, k)),            # A tile
                pl.BlockSpec((1, tk, h_pad), lambda b, i, k: (b, k, 0)),   # XW1 K tile
                pl.BlockSpec((1, tn, h_pad), lambda b, i, k: (b, i, 0)),   # XW1 row tile
                pl.BlockSpec((1, h_pad), lambda b, i, k: (0, 0)),          # b1 (BN folded)
                pl.BlockSpec((h_pad, o_pad), lambda b, i, k: (0, 0)),      # W2
                pl.BlockSpec((1, o_pad), lambda b, i, k: (0, 0)),          # b2
            ],
            out_specs=pl.BlockSpec((1, tn, o_pad), lambda b, i, k: (b, i, 0)),
            scratch_shapes=[pltpu.VMEM((tn, h_pad), jnp.float32)],
        ),
        compiler_params=pltpu.CompilerParams(
            dimension_semantics=("parallel", "parallel", "arbitrary"),
            vmem_limit_bytes=vmem_limit),
    )(a_in, xw1_in, xw1_in, b1p, w2_in, b2p)

    # Consumers that can take the padded (B, n_pad, o_pad) buffer directly
    # avoid this extra slice/copy pass; kept here to match the module's shape.
    return out_padded[:, :N, :out_dim]


def init_params(key, in_dim, hidden_dim, out_dim):
    """PyTorch-Linear-style uniform init, deterministic."""
    k1, k2, k3, k4 = jax.random.split(key, 4)
    lim1 = 1.0 / jnp.sqrt(in_dim)
    lim2 = 1.0 / jnp.sqrt(hidden_dim)
    return {
        "w1": jax.random.uniform(k1, (in_dim, hidden_dim), jnp.float32, -lim1, lim1),
        "b1": jax.random.uniform(k2, (hidden_dim,), jnp.float32, -lim1, lim1),
        "w2": jax.random.uniform(k3, (hidden_dim, out_dim), jnp.float32, -lim2, lim2),
        "b2": jax.random.uniform(k4, (out_dim,), jnp.float32, -lim2, lim2),
        "bn_gamma": jnp.ones((hidden_dim,), jnp.float32),
        "bn_beta": jnp.zeros((hidden_dim,), jnp.float32),
        "bn_mean": jnp.zeros((hidden_dim,), jnp.float32),
        "bn_var": jnp.ones((hidden_dim,), jnp.float32),
    }


def gin_reference(features, A, params, eps=0.01):
    """Pure-JAX reference (un-fused form of the PyTorch module, eval-mode BN)."""
    N = A.shape[0]
    a_hat = A + (1.0 + eps) * jnp.eye(N, dtype=A.dtype)
    agg = jnp.einsum("nm,bmc->bnc", a_hat, features)
    z1 = agg @ params["w1"] + params["b1"]
    scale = params["bn_gamma"] / jnp.sqrt(params["bn_var"] + 1e-5)
    shift = params["bn_beta"] - params["bn_mean"] * scale
    h1 = jnp.maximum(z1 * scale + shift, 0.0)
    return h1 @ params["w2"] + params["b2"]


if __name__ == "__main__":
    key = jax.random.PRNGKey(0)
    k_feat, k_adj, k_par = jax.random.split(key, 3)

    B, N, C_in, HID = 2, 16, 8, 32
    OUT = C_in  # out_dim == 0 in the module -> out_dim = in_dim

    features = jax.random.normal(k_feat, (B, N, C_in), jnp.float32)
    A = (jax.random.uniform(k_adj, (N, N), jnp.float32) > 0.7).astype(jnp.float32)
    A = jnp.maximum(A, A.T)  # symmetric adjacency

    params = init_params(k_par, C_in, HID, OUT)
    ref = gin_reference(features, A, params, eps=0.01)

    # Exact-math path (f32 operands): tight tolerance.
    out_f32 = jax.block_until_ready(
        gin_forward(features, A, params, eps=0.01, matmul_dtype=jnp.float32))
    assert out_f32.shape == (B, N, OUT), out_f32.shape
    assert jnp.allclose(out_f32, ref, atol=1e-4, rtol=1e-4), \
        float(jnp.max(jnp.abs(out_f32 - ref)))

    # Default bf16-operand path: dtype-aware (looser) tolerance.
    out_bf16 = jax.block_until_ready(gin_forward(features, A, params, eps=0.01))
    assert out_bf16.shape == (B, N, OUT), out_bf16.shape
    assert jnp.allclose(out_bf16, ref, atol=1e-1, rtol=1e-1), \
        float(jnp.max(jnp.abs(out_bf16 - ref)))

    print("KERNEL_OK")
</pallas_src>

<mosaic_0001>
module attributes {stable_mosaic.version = 11 : i64} {
  func.func @_gin_kernel(%arg0: i32, %arg1: i32, %arg2: i32, %arg3: memref<16x16xf32, #tpu.memory_space<vmem>>, %arg4: memref<1x16x128xf32, #tpu.memory_space<vmem>>, %arg5: memref<1x16x128xf32, #tpu.memory_space<vmem>>, %arg6: memref<1x128xf32, #tpu.memory_space<vmem>>, %arg7: memref<128x128xf32, #tpu.memory_space<vmem>>, %arg8: memref<1x128xf32, #tpu.memory_space<vmem>>, %arg9: memref<1x16x128xf32, #tpu.memory_space<vmem>>, %arg10: memref<16x128xf32, #tpu.memory_space<vmem>>) attributes {dimension_semantics = [#tpu.dimension_semantics<parallel>, #tpu.dimension_semantics<parallel>, #tpu.dimension_semantics<arbitrary>], iteration_bounds = array<i64: 2, 1, 1>, scalar_prefetch = 0 : i64, scratch_operands = 1 : i64, tpu.core_type = #tpu.core_type<tc>, window_params = [{transform_indices = @transform_0, window_bounds = array<i64: 16, 16>}, {transform_indices = @transform_1, window_bounds = array<i64: 1, 16, 128>}, {transform_indices = @transform_2, window_bounds = array<i64: 1, 16, 128>}, {pipeline_mode = #tpu.pipeline_mode<synchronous>, transform_indices = @transform_3, window_bounds = array<i64: 1, 128>}, {pipeline_mode = #tpu.pipeline_mode<synchronous>, transform_indices = @transform_4, window_bounds = array<i64: 128, 128>}, {pipeline_mode = #tpu.pipeline_mode<synchronous>, transform_indices = @transform_5, window_bounds = array<i64: 1, 128>}, {transform_indices = @transform_6, window_bounds = array<i64: 1, 16, 128>}]} {
    %c0_i32 = arith.constant 0 : i32
    %0 = arith.cmpi eq, %arg2, %c0_i32 : i32
    %1 = arith.extui %0 : i1 to i32
    %c0_i32_0 = arith.constant 0 : i32
    %2 = arith.cmpi ne, %1, %c0_i32_0 : i32
    scf.if %2 {
      %c0_11 = arith.constant 0 : index
      %c0_12 = arith.constant 0 : index
      %c0_13 = arith.constant 0 : index
      %13 = vector.load %arg5[%c0_11, %c0_12, %c0_13] : memref<1x16x128xf32, #tpu.memory_space<vmem>>, vector<1x16x128xf32>
      %14 = vector.shape_cast %13 : vector<1x16x128xf32> to vector<16x128xf32>
      %cst_14 = arith.constant 1.010000e+00 : f32
      %15 = vector.broadcast %cst_14 : f32 to vector<16x128xf32>
      %16 = arith.mulf %15, %14 : vector<16x128xf32>
      %c0_15 = arith.constant 0 : index
      %c0_16 = arith.constant 0 : index
      %17 = vector.load %arg10[%c0_15, %c0_16] : memref<16x128xf32, #tpu.memory_space<vmem>>, vector<16x128xf32>
      tpu.vector_store %arg10[%c0_15, %c0_16], %16 {strides = array<i32>} : memref<16x128xf32, #tpu.memory_space<vmem>>, vector<16x128xf32>,
    } else {
    }
    %c0 = arith.constant 0 : index
    %c0_1 = arith.constant 0 : index
    %3 = vector.load %arg10[%c0, %c0_1] : memref<16x128xf32, #tpu.memory_space<vmem>>, vector<16x128xf32>
    %c0_2 = arith.constant 0 : index
    %c0_3 = arith.constant 0 : index
    %4 = vector.load %arg3[%c0_2, %c0_3] : memref<16x16xf32, #tpu.memory_space<vmem>>, vector<16x16xf32>
    %c0_4 = arith.constant 0 : index
    %c0_5 = arith.constant 0 : index
    %c0_6 = arith.constant 0 : index
    %5 = vector.load %arg4[%c0_4, %c0_5, %c0_6] : memref<1x16x128xf32, #tpu.memory_space<vmem>>, vector<1x16x128xf32>
    %6 = vector.shape_cast %5 : vector<1x16x128xf32> to vector<16x128xf32>
    %cst = arith.constant dense<0.000000e+00> : vector<16x128xf32>
    %7 = tpu.matmul %4, %6, %cst {dimension_numbers = #tpu.dot_dimension_numbers<[1], [0], [0], [1], [0, 0, 1, 1], [], []>} : vector<16x16xf32>, vector<16x128xf32>, vector<16x128xf32> -> vector<16x128xf32>
    %8 = arith.addf %3, %7 : vector<16x128xf32>
    %c0_7 = arith.constant 0 : index
    %c0_8 = arith.constant 0 : index
    %9 = vector.load %arg10[%c0_7, %c0_8] : memref<16x128xf32, #tpu.memory_space<vmem>>, vector<16x128xf32>
    tpu.vector_store %arg10[%c0_7, %c0_8], %8 {strides = array<i32>} : memref<16x128xf32, #tpu.memory_space<vmem>>, vector<16x128xf32>,
    %c0_i32_9 = arith.constant 0 : i32
    %10 = arith.cmpi eq, %arg2, %c0_i32_9 : i32
    %11 = arith.extui %10 : i1 to i32
    %c0_i32_10 = arith.constant 0 : i32
    %12 = arith.cmpi ne, %11, %c0_i32_10 : i32
    scf.if %12 {
      %c0_11 = arith.constant 0 : index
      %c0_12 = arith.constant 0 : index
      %13 = vector.load %arg10[%c0_11, %c0_12] : memref<16x128xf32, #tpu.memory_space<vmem>>, vector<16x128xf32>
      %c0_13 = arith.constant 0 : index
      %c0_14 = arith.constant 0 : index
      %14 = vector.load %arg6[%c0_13, %c0_14] : memref<1x128xf32, #tpu.memory_space<vmem>>, vector<1x128xf32>
      %15 = vector.broadcast %14 : vector<1x128xf32> to vector<16x128xf32>
      %16 = arith.addf %13, %15 : vector<16x128xf32>
      %cst_15 = arith.constant 0.000000e+00 : f32
      %17 = vector.broadcast %cst_15 : f32 to vector<16x128xf32>
      %18 = arith.maximumf %16, %17 : vector<16x128xf32>
      %c0_16 = arith.constant 0 : index
      %c0_17 = arith.constant 0 : index
      %19 = vector.load %arg7[%c0_16, %c0_17] : memref<128x128xf32, #tpu.memory_space<vmem>>, vector<128x128xf32>
      %cst_18 = arith.constant dense<0.000000e+00> : vector<16x128xf32>
      %20 = tpu.matmul %18, %19, %cst_18 {dimension_numbers = #tpu.dot_dimension_numbers<[1], [0], [0], [1], [0, 0, 1, 1], [], []>} : vector<16x128xf32>, vector<128x128xf32>, vector<16x128xf32> -> vector<16x128xf32>
      %c0_19 = arith.constant 0 : index
      %c0_20 = arith.constant 0 : index
      %21 = vector.load %arg8[%c0_19, %c0_20] : memref<1x128xf32, #tpu.memory_space<vmem>>, vector<1x128xf32>
      %22 = vector.broadcast %21 : vector<1x128xf32> to vector<16x128xf32>
      %23 = arith.addf %20, %22 : vector<16x128xf32>
      %c0_21 = arith.constant 0 : index
      %c0_22 = arith.constant 0 : index
      %c0_23 = arith.constant 0 : index
      %24 = vector.load %arg9[%c0_21, %c0_22, %c0_23] : memref<1x16x128xf32, #tpu.memory_space<vmem>>, vector<1x16x128xf32>
      %25 = vector.shape_cast %24 : vector<1x16x128xf32> to vector<16x128xf32>
      %26 = vector.shape_cast %23 : vector<16x128xf32> to vector<1x16x128xf32>
      tpu.vector_store %arg9[%c0_21, %c0_22, %c0_23], %26 {strides = array<i32>} : memref<1x16x128xf32, #tpu.memory_space<vmem>>, vector<1x16x128xf32>,
    } else {
    }
    return
  }
  func.func @transform_0(%arg0: i32, %arg1: i32, %arg2: i32) -> (i32, i32) {
    %c0_i32 = arith.constant 0 : i32
    return %arg1, %arg2 : i32, i32
  }
  func.func @transform_1(%arg0: i32, %arg1: i32, %arg2: i32) -> (i32, i32, i32) {
    %c0_i32 = arith.constant 0 : i32
    %c0_i32_0 = arith.constant 0 : i32
    return %arg0, %arg2, %c0_i32 : i32, i32, i32
  }
  func.func @transform_2(%arg0: i32, %arg1: i32, %arg2: i32) -> (i32, i32, i32) {
    %c0_i32 = arith.constant 0 : i32
    %c0_i32_0 = arith.constant 0 : i32
    return %arg0, %arg1, %c0_i32 : i32, i32, i32
  }
  func.func @transform_3(%arg0: i32, %arg1: i32, %arg2: i32) -> (i32, i32) {
    %c0_i32 = arith.constant 0 : i32
    %c0_i32_0 = arith.constant 0 : i32
    %c0_i32_1 = arith.constant 0 : i32
    return %c0_i32, %c0_i32_0 : i32, i32
  }
  func.func @transform_4(%arg0: i32, %arg1: i32, %arg2: i32) -> (i32, i32) {
    %c0_i32 = arith.constant 0 : i32
    %c0_i32_0 = arith.constant 0 : i32
    %c0_i32_1 = arith.constant 0 : i32
    return %c0_i32, %c0_i32_0 : i32, i32
  }
  func.func @transform_5(%arg0: i32, %arg1: i32, %arg2: i32) -> (i32, i32) {
    %c0_i32 = arith.constant 0 : i32
    %c0_i32_0 = arith.constant 0 : i32
    %c0_i32_1 = arith.constant 0 : i32
    return %c0_i32, %c0_i32_0 : i32, i32
  }
  func.func @transform_6(%arg0: i32, %arg1: i32, %arg2: i32) -> (i32, i32, i32) {
    %c0_i32 = arith.constant 0 : i32
    %c0_i32_0 = arith.constant 0 : i32
    return %arg0, %arg1, %c0_i32 : i32, i32, i32
  }
}

</mosaic_0001>

<bundles_post_ra>
// kernel: tpu_custom_call.1
= control target key start
LH: loop header
LB: loop body
LE: loop exit
PB: predicated region body
PF: predicated region fallthrough
CT: control target
= control target key end

     0   :  { %s1557_s0 = inlined_call_operand.hbm [shape: f32[16,16], index: 0, kind: input, shape index: {}]   ;;  %s1558_s1 = inlined_call_operand.hbm [shape: f32[2,16,128], index: 1, kind: input, shape index: {}]   ;;  %s1559_s2 = inlined_call_operand.hbm [shape: f32[2,16,128], index: 2, kind: input, shape index: {}]   ;;  %s1560_s3 = inlined_call_operand.vmem [shape: f32[1,128], index: 3, kind: input, shape index: {}]   ;;  %s1561_s4 = inlined_call_operand.hbm [shape: f32[128,128], index: 4, kind: input, shape index: {}]   ;;  %s1562_s5 = inlined_call_operand.vmem [shape: f32[1,128], index: 5, kind: input, shape index: {}]   ;;  %s1563_s6 = inlined_call_operand.hbm [shape: f32[2,16,128], index: 6, kind: output, shape index: {}]  }
   0x1   :  { %1574 = sst [smem:[#allocation18_spill]] %s1558_s1 }
   0x2   :  { %1575 = sst [smem:[#allocation19_spill]] %s1559_s2 }
   0x3   :  { %11 = vsyncpa [#allocation4], 0 }
   0x4   :  { %12 = vsyncpa [#allocation7], 0 }
   0x5   :  { %14 = vsyncpa [#allocation7 + $0x1], 0 }
   0x6   :  { %15 = vsyncpa [#allocation10], 0 }
   0x7   :  { %16 = vsyncpa [#allocation5], 0 }
   0x8   :  { %18 = vsyncpa [#allocation5 + $0x1], 0  ;;  %s1228_s21 = smov 0   ;;  %s1230_s22 = smov 0  }
   0x9   :  { %s1232_s23 = smov 0   ;;  %s1234_s24 = smov 0  }
   0xa   :  { %s1236_s25 = smov 0   ;;  %s1238_s26 = smov 0  }
   0xb LB: > { %1576 = sst [smem:[#allocation16_spill]] %s1178_s25  ;;  %s43_s27 = sadd.s32 1, %s1178_s25  ;;  %s1182_s26 = sphi %s1238_s26, %s24_s26   ;;  %s1178_s25 = sphi %s1236_s25, %s1599_s25   ;;  %s1174_s24 = sphi %s1234_s24, %s1598_s24   ;;  %s1170_s23 = sphi %s1232_s23, %s1602_s23   ;;  %s1166_s22 = sphi %s1230_s22, %s1601_s22   ;;  %s1162_s21 = sphi %s1228_s21, %s1600_s21  }
   0xc   : > { %s80_s28 = sadd.s32 1, %s1170_s23  ;;  %p45_p0 = scmp.ge.s32.totalorder %s43_s27, 2 }
   0xd   : > { %p87_p1 = scmp.ne.s32.totalorder %s1170_s23, %s1166_s22  ;;  %p88_p2 = scmp.eq.s32.totalorder %s1182_s26, 0 }
   0xe   : > { %s1604_s27 = smov (%p45_p0, %s43_s27), 0  ;;  %p918_p6 = scmp.lt.s32.totalorder %s1182_s26, 2 }
   0xf   : > { %1577 = sst [smem:[#allocation17_spill]] %s1604_s27  ;;  %p1268_p3 = por %p88_p2, %p87_p1 }
  0x10   : > { %s75_s30 = ssub.s32 %s1178_s25, %s1604_s27  ;;  %s272_s7 = sand.u32 1, %s1182_s26  }
  0x11   : > { %p78_p5 = scmp.eq.s32.totalorder %s75_s30, 0  ;;  %s274_s8 = sand.u32 1, %s1170_s23  }
  0x12   : > { %s1281_s10 = sshll.u32 %s274_s8, 4  ;;  %s781_s11 = sshll.u32 %s1178_s25, 8 }
  0x13   : > { %s1279_s9 = scalar_select %p78_p5, %s1170_s23, %s80_s28  }
  0x14   : > { %s1579_s1 = sld [smem:[#allocation18_spill]]  ;;  %s276_s15 = scalar_lea.vmem [#allocation6], %s1281_s10 }
  0x15   : > { %s285_s16 = sshll.u32 %s276_s15, 4  ;;  %p1294_p7 = pnand %p918_p6, %p1268_p3  ;;  %s1290_s16 = int_to_ptr.vmem [resolvable:$true] %s285_s16 }
  0x16   : > { %s1581_s2 = sld [smem:[#allocation19_spill]]  ;;  %s1303_s28 = scalar_lea.sflag [#allocation7], %s272_s7 }
  0x17   : > { %p978_p9 = pneg %p1294_p7 }
  0x1a   : > { %s1287_s14 = scalar_lea.hbm %s1579_s1, %s781_s11  ;;  %s981_s12 = scalar_lea.hbm %s1579_s1, 512 }
  0x1b   : > { %s976_s30 = scalar_lea.hbm %s1287_s14, 256  ;;  %p982_p12 = scmp.lt.u32.totalorder %s1287_s14, %s1579_s1 }
  0x1c   : > { %s1301_s20 = scalar_lea.hbm %s1581_s2, %s781_s11  ;;  %p977_p8 = scmp.ne.s32.totalorder %s1287_s14, %s976_s30 }
  0x1d   : > { %p983_p13 = scmp.lt.u32.totalorder %s981_s12, %s976_s30  ;;  %p985_p2 = scmp.lt.u32.totalorder %s976_s30, %s1287_s14 }
  0x1e   : > { %p979_p10 = pnand %p978_p9, %p977_p8 }
  0x1f   : > { %p984_p0 = por %p983_p13, %p982_p12 }
  0x20   : > { %p980_p11 = pneg %p979_p10 }
  0x21   : > { %p986_p3 = por %p985_p2, %p984_p0 }
  0x23   : > { %p987_p5 = pnand %p986_p3, %p980_p11 }
  0x25   : > { %990 = shalt.err (!%p987_p5)
}
  0x26   : > { %s991_s7 = scalar_lea.vmem %s1290_s16, 256  ;;  %s1184_s11 = smov [#allocation6]  }
  0x27   : > { %p992_p6 = scmp.ne.s32.totalorder %s1290_s16, %s991_s7  ;;  %s996_s18 = sshll.u32 %s1184_s11, 4  ;;  %s997_s18 = int_to_ptr.vmem [resolvable:$false] %s996_s18 }
  0x28   : > { %s998_s19 = scalar_lea.vmem %s997_s18, 512  ;;  %p999_p4 = scmp.lt.s32.totalorder %s1290_s16, %s997_s18 }
  0x29   : > { %p994_p8 = pnand %p992_p6, %p978_p9  ;;  %p1000_p12 = scmp.lt.s32.totalorder %s998_s19, %s991_s7 }
  0x2b   : > { %p995_p10 = pneg %p994_p8  ;;  %p1001_p13 = por %p1000_p12, %p999_p4 }
  0x2d   : > { %p1002_p0 = pnand %p1001_p13, %p995_p10 }
  0x2f   : > { %1005 = shalt.err (!%p1002_p0)
}
  0x30   : > { %s1564_s30 = smov 128   ;;  %s1566_s29 = smov 8  }
  0x31   : > { %908 = dma.hbm_to_vmem [thread:$0]  (!%p1294_p7), %s1287_s14, 256, %s1290_s16, %s1303_s28, %s1564_s30, %s1564_s30, %s1566_s29  }
  0x32   : > { %s299_s8 = scalar_lea.vmem [#allocation8], %s1281_s10  ;;  %s1336_s13 = sadd.s32 4294967295, %s1182_s26  }
  0x33   : > { %s308_s12 = sshll.u32 %s299_s8, 4  ;;  %s755_s15 = sadd.s32 4294967294, %s1182_s26   ;;  %s1366_s12 = int_to_ptr.vmem [resolvable:$true] %s308_s12 }
  0x34   : > { %p93_p4 = scmp.ne.s32.totalorder %s1166_s22, %s1162_s21  ;;  %p1569_p11 = scmp.eq.s32.totalorder %s1336_s13, 0 }
  0x35   : > { %p210_p2 = scmp.eq.s32.totalorder %s1336_s13, 1  ;;  %p216_p3 = scmp.eq.s32.totalorder %s755_s15, 1 }
  0x36   : > { %p756_p5 = scmp.ge.s32.totalorder %s1182_s26, 1  ;;  %p1346_p6 = por %p1569_p11, %p93_p4 }
  0x37   : > { %p1353_p8 = por %p210_p2, %p87_p1  ;;  %p1357_p10 = por %p216_p3, %p93_p4 }
  0x38   : > { %s1582_s7 = scalar_select %p1346_p6, 1, 0 }
  0x39   : > { %s1583_s10 = scalar_select %p1353_p8, 1, 0 }
  0x3a   : > { %s1584_s14 = scalar_select %p1357_p10, 1, 0 }
  0x3b   : > { %p223_p12 = scmp.lt.s32.totalorder %s1182_s26, 3  ;;  %s1187_s11 = smov [#allocation3]  }
  0x3c   : > { %s239_s18 = sshll.u32 %s1187_s11, 4  ;;  %s1188_s19 = smov [#allocation9]   ;;  %s1370_s18 = int_to_ptr.vmem [resolvable:$true] %s239_s18 }
  0x3d   : > { %p1362_p13 = pnand %p756_p5, %p223_p12  ;;  %s255_s8 = sshll.u32 %s1188_s19, 4  ;;  %s1378_s8 = int_to_ptr.vmem [resolvable:$true] %s255_s8 }
  0x3e   : > { %s1006_s30 = scalar_lea.hbm %s1301_s20, 256  ;;  %s1011_s1 = scalar_lea.hbm %s1581_s2, 512 }
  0x3f   : > { %s1585_s16 = scalar_select %p1362_p13, 1, 0 }
  0x40   : > { %p898_p1 = pneg %p1362_p13  ;;  %p1007_p4 = scmp.ne.s32.totalorder %s1301_s20, %s1006_s30 }
  0x41   : > { %p1012_p5 = scmp.lt.u32.totalorder %s1301_s20, %s1581_s2  ;;  %p1013_p12 = scmp.lt.u32.totalorder %s1011_s1, %s1006_s30 }
  0x42   : > { %p1374_p0 = pnand %p898_p1, %p1569_p11  ;;  %p1009_p2 = pnand %p1007_p4, %p978_p9 }
  0x43   : > { %p1014_p1 = por %p1013_p12, %p1012_p5  ;;  %p1015_p11 = scmp.lt.u32.totalorder %s1006_s30, %s1301_s20 }
  0x44   : > { %p1010_p3 = pneg %p1009_p2 }
  0x45   : > { %p1016_p10 = por %p1015_p11, %p1014_p1 }
  0x47   : > { %p1017_p8 = pnand %p1016_p10, %p1010_p3 }
  0x49   : > { %1020 = shalt.err (!%p1017_p8)
}
  0x4a   : > { %s1021_s25 = scalar_lea.vmem %s1366_s12, 256  ;;  %s1189_s29 = smov [#allocation8]  }
  0x4b   : > { %p1022_p4 = scmp.ne.s32.totalorder %s1366_s12, %s1021_s25  ;;  %s1026_s11 = sshll.u32 %s1189_s29, 4  ;;  %s1027_s11 = int_to_ptr.vmem [resolvable:$false] %s1026_s11 }
  0x4c   : > { %s1028_s27 = scalar_lea.vmem %s1027_s11, 512  ;;  %p1029_p13 = scmp.lt.s32.totalorder %s1366_s12, %s1027_s11 }
  0x4d   : > { %p1024_p2 = pnand %p1022_p4, %p978_p9  ;;  %p1030_p5 = scmp.lt.s32.totalorder %s1028_s27, %s1021_s25 }
  0x4f   : > { %p1025_p6 = pneg %p1024_p2  ;;  %p1031_p12 = por %p1030_p5, %p1029_p13 }
  0x51   : > { %p1032_p11 = pnand %p1031_p12, %p1025_p6 }
  0x53   : > { %1035 = shalt.err (!%p1032_p11)
}
  0x54   : > { %s1587_s1 = smov 8   ;;  %s1588_s30 = smov 128  }
  0x55   : > { %911 = dma.hbm_to_vmem [thread:$0]  (!%p1294_p7), %s1301_s20, 256, %s1366_s12, %s1303_s28, %s1588_s30, %s1588_s30, %s1587_s1  }
  0x56   : > { %s1036_s2 = scalar_lea.hbm %s1557_s0, 256  ;;  %p1038_p6 = pneg %p1374_p0 }
  0x57   : > { %p1037_p9 = scmp.ne.s32.totalorder %s1557_s0, %s1036_s2  ;;  %p1043_p13 = scmp.lt.u32.totalorder %s1036_s2, %s1557_s0 }
  0x59   : > { %p1039_p8 = pnand %p1038_p6, %p1037_p9 }
  0x5b   : > { %p1040_p10 = pneg %p1039_p8 }
  0x5d   : > { %p1045_p3 = pnand %p1043_p13, %p1040_p10 }
  0x5f   : > { %1048 = shalt.err (!%p1045_p3)
}
  0x60   : > { %s1049_s20 = scalar_lea.vmem %s1370_s18, 256  ;;  %p1057_p2 = scmp.lt.s32.totalorder %s1370_s18, %s1370_s18 }
  0x61   : > { %p1050_p7 = scmp.ne.s32.totalorder %s1370_s18, %s1049_s20  ;;  %p1058_p5 = scmp.lt.s32.totalorder %s1049_s20, %s1049_s20 }
  0x63   : > { %p1052_p1 = pnand %p1050_p7, %p1038_p6  ;;  %p1059_p12 = por %p1058_p5, %p1057_p2 }
  0x65   : > { %p1053_p4 = pneg %p1052_p1 }
  0x67   : > { %p1060_p11 = pnand %p1059_p12, %p1053_p4 }
  0x69   : > { %1063 = shalt.err (!%p1060_p11)
}
  0x6a   : > { %901 = dma.hbm_to_vmem [thread:$0]  (!%p1374_p0), %s1557_s0, 256, %s1370_s18, [#allocation4], %s1588_s30, %s1588_s30, %s1587_s1  }
  0x6b   : > { %s1064_s29 = scalar_lea.hbm %s1561_s4, 2048 }
  0x6c   : > { %p1065_p9 = scmp.ne.s32.totalorder %s1561_s4, %s1064_s29  ;;  %p1071_p13 = scmp.lt.u32.totalorder %s1064_s29, %s1561_s4 }
  0x6e   : > { %p1067_p8 = pnand %p1065_p9, %p1038_p6 }
  0x70   : > { %p1068_p10 = pneg %p1067_p8 }
  0x72   : > { %p1073_p3 = pnand %p1071_p13, %p1068_p10 }
  0x74   : > { %1076 = shalt.err (!%p1073_p3)
}
  0x75   : > { %s1077_s18 = scalar_lea.vmem %s1378_s8, 2048  ;;  %p1085_p2 = scmp.lt.s32.totalorder %s1378_s8, %s1378_s8 }
  0x76   : > { %p1078_p7 = scmp.ne.s32.totalorder %s1378_s8, %s1077_s18  ;;  %p1086_p5 = scmp.lt.s32.totalorder %s1077_s18, %s1077_s18 }
  0x78   : > { %p1080_p1 = pnand %p1078_p7, %p1038_p6  ;;  %p1087_p12 = por %p1086_p5, %p1085_p2 }
  0x7a   : > { %p1081_p4 = pneg %p1080_p1 }
  0x7c   : > { %p1088_p11 = pnand %p1087_p12, %p1081_p4 }
  0x7e   : > { %1091 = shalt.err (!%p1088_p11)
}
  0x7f   : > { %904 = dma.hbm_to_vmem [thread:$0]  (!%p1374_p0), %s1561_s4, 2048, %s1378_s8, [#allocation10], %s1588_s30, %s1588_s30, %s1587_s1  }
  0x80   : > { %p1589_p9 = scmp.ne.s32.totalorder %s1585_s16, 0 }
  0x81   : > { %p1590_p6 = scmp.eq.s32.totalorder (!%p1589_p9), %s1336_s13, 0 }
  0x82   : > { %320 = sbr.rel (%p1589_p9) target bundleno = 603 (0x25b), region = 44 }
  0x89   : > { %1145 = dma.done.wait (%p1590_p6), [#allocation4], 256   ;;  %p1591_p8 = pmov %p1590_p6 }
  0x8a   : > { %s326_s15 = sand.u32 1, %s1336_s13   ;;  %s328_s28 = sand.u32 1, %s1166_s22  }
  0x8b   : > { %1147 = vsyncadd (%p1591_p8), [#allocation4], 4294967040  ;;  %s1475_s12 = sshll.u32 %s328_s28, 4  ;;  %s327_s8 = scalar_lea.sflag [#allocation7], %s326_s15 }
  0x8c   : > { %s330_s1 = scalar_lea.vmem [#allocation6], %s1475_s12  ;;  %p1592_p0 = scmp.ne.s32.totalorder %s1582_s7, 0 }
  0x8e   : > { %1149 = dma.done.wait (%p1592_p0), %s327_s8, 512  }
  0x8f   : > { %1151 = vsyncadd (%p1592_p0), %s327_s8, 4294966784  ;;  %s339_s16 = scalar_lea.vmem [#allocation8], %s1475_s12  ;;  %p1593_p10 = pmov %p1590_p6 }
  0x90   : > { %p1594_p13 = pmov %p1590_p6 }
  0x91   : > { %1153 = dma.done.wait (%p1593_p10), [#allocation10], 2048  }
  0x92   : > { %1155 = vsyncadd (%p1594_p13), [#allocation10], 4294965248  ;;  %vm397_vm0 = vcmask 130048   ;;  %v395_v0 = vld [vmem:[%s330_s1] sm:$0xff]  ;;  %v396_v1 = vld [vmem:[%s330_s1 + $0x8] sm:$0xff]  ;;  %s376_s30 = scalar_lea.vmem [#allocation11], %s1475_s12 }
  0x93   : > { %v393_v2 = vld [vmem:[#allocation3] sm:$0xff]  ;;  %v848_v3 = vpack.c.bf16 %v396_v1, %v395_v0  ;;  %v499_v4 = vld [vmem:[#allocation9] sm:$0xff]  ;;  %v500_v5 = vld [vmem:[#allocation9 + $0x8] sm:$0xff]  ;;  %s615_s19 = sshll.u32 %s376_s30, 4  ;;  %s783_s25 = sshll.u32 %s1174_s24, 8  ;;  %s1501_s19 = int_to_ptr.vmem [resolvable:$true] %s615_s19 }
  0x94   : > { %810 = vmatprep.mubr.msk.f32.mxu0 %vm397_vm0, %v393_v2  ;;  %v852_v6 = vpack.c.bf16 %v500_v5, %v499_v4  ;;  %v501_v7 = vld [vmem:[#allocation9 + $0x10] sm:$0xff]  ;;  %v502_v8 = vld [vmem:[#allocation9 + $0x18] sm:$0xff]  ;;  %v503_v10 = vld [vmem:[#allocation9 + $0x20] sm:$0xff]  ;;  %s1506_s18 = scalar_lea.hbm %s1563_s6, %s783_s25  ;;  %s1510_s20 = scalar_lea.sflag [#allocation5], %s328_s28 }
  0x95   : > { %849 = vmatprep.subr.bf16.mxu0 %v848_v3  ;;  %v856_v9 = vpack.c.bf16 %v502_v8, %v501_v7  ;;  %v504_v11 = vld [vmem:[#allocation9 + $0x28] sm:$0xff]  ;;  %v394_v12 = vld [vmem:[#allocation3 + $0x8] sm:$0xff]  ;;  %v505_v14 = vld [vmem:[#allocation9 + $0x30] sm:$0xff]  ;;  %s1092_s24 = scalar_lea.vmem %s1501_s19, 256  ;;  %p1595_p7 = scmp.ne.s32.totalorder %s1583_s10, 0 }
  0x96   : > { %851 = vmatpush3.bf16.msra.mxu0 %v848_v3  ;;  %853 = vmatprep.subr.bf16.mxu1 %v852_v6  ;;  %v860_v13 = vpack.c.bf16 %v504_v11, %v503_v10  ;;  %v506_v15 = vld [vmem:[#allocation9 + $0x38] sm:$0xff]  ;;  %v507_v17 = vld [vmem:[#allocation9 + $0x40] sm:$0xff]  ;;  %v508_v18 = vld [vmem:[#allocation9 + $0x48] sm:$0xff]  ;;  %p1093_p3 = scmp.ne.s32.totalorder %s1501_s19, %s1092_s24  ;;  %s1190_s2 = smov [#allocation11]  }
  0x97   : > { %855 = vmatpush3.bf16.msra.mxu1 %v852_v6  ;;  %v864_v16 = vpack.c.bf16 %v506_v15, %v505_v14  ;;  %v868_v19 = vpack.c.bf16 %v508_v18, %v507_v17  ;;  %v509_v20 = vld [vmem:[#allocation9 + $0x50] sm:$0xff]  ;;  %v510_v21 = vld [vmem:[#allocation9 + $0x58] sm:$0xff]  ;;  %v511_v23 = vld [vmem:[#allocation9 + $0x60] sm:$0xff]  ;;  %s1096_s15 = sshll.u32 %s1190_s2, 4  ;;  %s1097_s15 = int_to_ptr.vmem [resolvable:$false] %s1096_s15 }
  0x98   : > { %857 = vmatprep.subr.bf16.mxu1 %v856_v9  ;;  %v872_v22 = vpack.c.bf16 %v510_v21, %v509_v20  ;;  %v512_v24 = vld [vmem:[#allocation9 + $0x68] sm:$0xff]  ;;  %v513_v26 = vld [vmem:[#allocation9 + $0x70] sm:$0xff]  ;;  %v514_v27 = vld [vmem:[#allocation9 + $0x78] sm:$0xff]  ;;  %p1094_p1 = pnand %p1093_p3, %p1595_p7  ;;  %s1098_s12 = scalar_lea.vmem %s1097_s15, 512 }
  0x99   : > { %811 = vmatmul.mubr.msk.f32.vlgmr.msra.gmra.mrb[0].mxu0 %vm397_vm0, %v394_v12  ;;  %v876_v25 = vpack.c.bf16 %v512_v24, %v511_v23  ;;  %v880_v28 = vpack.c.bf16 %v514_v27, %v513_v26  ;;  %v386_v29 = vld [vmem:[%s339_s16 + $0x8] sm:$0xff]  ;;  %v385_v30 = vld [vmem:[%s339_s16] sm:$0xff]  ;;  %p1099_p2 = scmp.lt.s32.totalorder %s1501_s19, %s1097_s15  ;;  %p1100_p5 = scmp.lt.s32.totalorder %s1098_s12, %s1092_s24 }
  0x9a   : > { %v388_v31 = vmul.f32 1.01, %v386_v29  ;;  %v387_v32 = vmul.f32 1.01, %v385_v30  ;;  %v774_v34 = vld [vmem:[%s1560_s3] ss:$0 sm:$0xff]  ;;  %p1095_p4 = pneg %p1094_p1 }
  0x9b   : > { %859 = vmatpush3.bf16.msra.mxu1 %v856_v9  ;;  %v775_v42 = vld [vmem:[%s1562_s5] ss:$0 sm:$0xff]  ;;  %p1101_p12 = por %p1100_p5, %p1099_p2 }
  0x9c   : > { %861 = vmatprep.subr.bf16.mxu1 %v860_v13 }
  0x9d   : > { %p1102_p11 = pnand %p1101_p12, %p1095_p4 }
  0x9f   : > { %863 = vmatpush3.bf16.msra.mxu1 %v860_v13 }
  0xa0   : > { %865 = vmatprep.subr.bf16.mxu1 %v864_v16 }
  0xa3   : > { %867 = vmatpush3.bf16.msra.mxu1 %v864_v16 }
  0xa4   : > { %869 = vmatprep.subr.bf16.mxu1 %v868_v19 }
  0xa7   : > { %871 = vmatpush3.bf16.msra.mxu1 %v868_v19 }
  0xa8   : > { %873 = vmatprep.subr.bf16.mxu1 %v872_v22 }
  0xab   : > { %875 = vmatpush3.bf16.msra.mxu1 %v872_v22 }
  0xac   : > { %877 = vmatprep.subr.bf16.mxu1 %v876_v25 }
  0xaf   : > { %879 = vmatpush3.bf16.msra.mxu1 %v876_v25 }
  0xb0   : > { %881 = vmatprep.subr.bf16.mxu1 %v880_v28 }
  0xb3   : > { %883 = vmatpush3.bf16.msra.mxu1 %v880_v28 }
 0x16c   : > { %v812_v33 = vpop.f32.mrb[0].mxu0 }
 0x16d   : > { %v480_v35 = vadd.f32 %v812_v33, %v388_v31  ;;  %v470_v36 = vpop.f32.mrb[1].mxu0 }
 0x16e   : > { %v479_v37 = vadd.f32 %v470_v36, %v387_v32 }
 0x16f   : > { %v496_v38 = vadd.f32 %v774_v34, %v480_v35 }
 0x170   : > { %v495_v39 = vadd.f32 %v774_v34, %v479_v37 }
 0x171   : > { %v498_v41 = vmax.f32 %v496_v38, 0.0 }
 0x172   : > { %v497_v40 = vmax.f32 %v495_v39, 0.0 }
 0x174   : > { %845 = vmatprep.mubr.f32.mxu1 %v497_v40 }
 0x175   : > { %846 = vmatmul.mubr.f32.vlgmr.msra.gmra.mrb[0].mxu1 %v498_v41 }
 0x248   : > { %v847_v43 = vpop.f32.mrb[0].mxu1 }
 0x249   : > { %v594_v44 = vadd.f32 %v847_v43, %v775_v42  ;;  %v588_v45 = vpop.f32.mrb[1].mxu1 }
 0x24a   : > { %v589_v46 = vadd.f32 %v775_v42, %v588_v45 }
 0x24b   : > { %598 = vst [vmem:[%s376_s30 + $0x8] sm:$0xff] %v594_v44 }
 0x24c   : > { %597 = vst [vmem:[%s376_s30] sm:$0xff] %v589_v46 }
 0x24d   : > { %1105 = shalt.err (!%p1102_p11)
}
 0x24e   : > { %s1106_s28 = scalar_lea.hbm %s1506_s18, 256  ;;  %s1110_s16 = scalar_lea.hbm %s1563_s6, 512 }
 0x24f   : > { %p1107_p9 = scmp.ne.s32.totalorder %s1506_s18, %s1106_s28  ;;  %p1111_p0 = scmp.lt.u32.totalorder %s1506_s18, %s1563_s6 }
 0x250   : > { %p1112_p10 = scmp.lt.u32.totalorder %s1110_s16, %s1106_s28  ;;  %p1114_p3 = scmp.lt.u32.totalorder %s1106_s28, %s1506_s18 }
 0x251   : > { %p1108_p6 = pnand %p1107_p9, %p1595_p7 }
 0x252   : > { %p1113_p13 = por %p1112_p10, %p1111_p0 }
 0x253   : > { %p1109_p8 = pneg %p1108_p6 }
 0x254   : > { %p1115_p1 = por %p1114_p3, %p1113_p13 }
 0x256   : > { %p1116_p4 = pnand %p1115_p1, %p1109_p8 }
 0x258   : > { %1119 = shalt.err (!%p1116_p4)
}
 0x259   : > { %s1191_s30 = smov 128   ;;  %s1192_s29 = smov 8  }
 0x25a   : > { %896 = dma.vmem_to_hbm [thread:$0]  (%p1595_p7), %s1501_s19, 256, %s1506_s18, %s1510_s20, %s1191_s30, %s1191_s30, %s1192_s29  }
 0x25b PF: > { %s630_s11 = sand.u32 1, %s1162_s21   ;;  %p1596_p2 = scmp.ne.s32.totalorder %s1584_s14, 0 }
 0x25c   : > { %p1597_p5 = scmp.ge.s32.totalorder %s1182_s26, 2  ;;  %s631_s25 = scalar_lea.sflag [#allocation5], %s630_s11 }
 0x25e   : > { %p913_p12 = pnand %p1597_p5, %p1596_p2 }
 0x260   : > { %1157 = dma.done.wait (!%p913_p12), %s631_s25, 256  }
 0x261   : > { %1159 = vsyncadd (!%p913_p12), %s631_s25, 4294967040  ;;  %s24_s26 = sadd.s32 1, %s1182_s26   ;;  %s1598_s24 = sld [smem:[#allocation16_spill]] }
 0x262   : > { %p21_p11 = scmp.ge.s32.totalorder %s24_s26, 4   ;;  %s1599_s25 = sld [smem:[#allocation17_spill]] }
 0x263   : > { %s1600_s21 = smov %s1166_s22  ;;  %s1601_s22 = smov %s1170_s23 }
 0x264   : > { %s1602_s23 = smov %s1279_s9  ;;  %23 = sbr.rel (!%p21_p11) target bundleno = 11 (0xb), region = 118 }
 0x26b   :  { %636 = vsyncpa [#allocation4], 1 }
 0x26c   :  { %638 = vsyncpa [#allocation4 + $0x1], 1 }
 0x26d   :  { %639 = vsyncpa [#allocation7], 1 }
 0x26e   :  { %641 = vsyncpa [#allocation7 + $0x1], 1 }
 0x26f   :  { %642 = vsyncpa [#allocation10], 1 }
 0x270   :  { %643 = vsyncpa [#allocation5], 1 }
 0x271   :  { %645 = vsyncpa [#allocation5 + $0x1], 1 }

</bundles_post_ra>
